<compile_context>
chip_gen: v6e
topology: v6e:2x2x1
jax: 0.10.0
libtpu: 0.0.40
codegen_flags: <defaults>
</compile_context>

<pallas_src>
import functools

import jax
import jax.numpy as jnp
from jax import lax
from jax.experimental import pallas as pl
from jax.experimental.pallas import tpu as pltpu

EPS_BN = 1e-5


# --------------------------------------------------------------------------- #
# Pass 1: time-chunked LSTM recurrence (encoder fused into the input projection)
# --------------------------------------------------------------------------- #
def lstm_chunk_kernel(
    x_ref,       # (TC*B, F)  f32   time-major rows of this chunk (row = t*B + b)
    h0_ref,      # (B, H)     f32   initial hidden state
    c0_ref,      # (B, H)     f32   initial cell state
    wx_ref,      # (F, 4H)    bf16  fused encoder+input->gate weights, (i|f|g|o)
    bx_ref,      # (1, 4H)    f32   fused gate bias (b_enc@W_ih + b_ih + b_hh)
    whh_ref,     # (H, 4H)    bf16  hidden->gate weights, (i|f|g|o)
    res_ref,     # out (TC*B, H) f32  hidden outputs for this chunk (streamed to HBM)
    h_out_ref,   # out (B, H)    f32  carried hidden state (constant block index)
    c_out_ref,   # out (B, H)    f32  carried cell state   (constant block index)
    ssum_ref,    # out (1, H)    f32  running sum of h   (BN mean numerator)
    qsum_ref,    # out (1, H)    f32  running sum of h^2 (BN var numerator)
    gx_ref,      # scratch (TC, B, 4H) f32  per-step input-side gate pre-activations
):
    B, H = h0_ref.shape
    TC = gx_ref.shape[0]

    # Initialize the carried state / BN accumulators on the first time chunk.
    @pl.when(pl.program_id(0) == 0)
    def _():
        h_out_ref[...] = h0_ref[...]
        c_out_ref[...] = c0_ref[...]
        ssum_ref[...] = jnp.zeros_like(ssum_ref)
        qsum_ref[...] = jnp.zeros_like(qsum_ref)

    # One MXU pass for the whole chunk's input-side gate pre-activations:
    # (TC*B, F) @ (F, 4H), bf16 operands, f32 accumulation, lane-dense 4H.
    gates_x = (
        jnp.dot(x_ref[...].astype(jnp.bfloat16), wx_ref[...],
                preferred_element_type=jnp.float32)
        + bx_ref[...]
    )
    # Re-layout to (TC, B, 4H) so per-step reads are aligned leading-axis loads
    # (one relayout per chunk, off the serial recurrence path).
    for t in range(TC):
        gx_ref[t] = gates_x[t * B:(t + 1) * B, :]

    whh = whh_ref[...]
    h = h_out_ref[...]
    c = c_out_ref[...]
    s_acc = jnp.zeros((B, H), jnp.float32)
    q_acc = jnp.zeros((B, H), jnp.float32)

    # Serial recurrence over the chunk (TC static & small; grid boundary bounds
    # the unroll / live ranges even for large T).
    for t in range(TC):
        gates = gx_ref[t] + jnp.dot(
            h.astype(jnp.bfloat16), whh, preferred_element_type=jnp.float32)
        sig = jax.nn.sigmoid(gates)   # one EUP pass over the full (B, 4H) vreg
        tnh = jnp.tanh(gates)         # one EUP pass over the full (B, 4H) vreg
        i_g = sig[:, 0 * H:1 * H]
        f_g = sig[:, 1 * H:2 * H]
        g_g = tnh[:, 2 * H:3 * H]
        o_g = sig[:, 3 * H:4 * H]
        c = f_g * c + i_g * g_g
        h = o_g * jnp.tanh(c)
        res_ref[t * B:(t + 1) * B, :] = h
        s_acc = s_acc + h
        q_acc = q_acc + h * h

    h_out_ref[...] = h
    c_out_ref[...] = c
    ssum_ref[...] += jnp.sum(s_acc, axis=0, keepdims=True)
    qsum_ref[...] += jnp.sum(q_acc, axis=0, keepdims=True)


# --------------------------------------------------------------------------- #
# Pass 2: BatchNorm1d (batch stats) folded into the classifier Linear
# --------------------------------------------------------------------------- #
def bn_head_kernel(
    res_ref,     # (RB, H)  f32  LSTM hidden outputs (row block)
    ssum_ref,    # (1, H)   f32  sum of h over all T*B rows
    qsum_ref,    # (1, H)   f32  sum of h^2 over all T*B rows
    gamma_ref,   # (1, H)   f32  BatchNorm1d weight
    beta_ref,    # (1, H)   f32  BatchNorm1d bias
    wout_t_ref,  # (Cp, H)  f32  classifier weight, transposed, zero-padded C -> Cp
    bout_ref,    # (1, Cp)  f32  classifier bias, zero-padded
    logits_ref,  # out (RB, Cp) f32  lane-dense padded logits
    *,
    inv_n,       # 1.0 / (T*B)
):
    mean = ssum_ref[...] * inv_n
    var = jnp.maximum(qsum_ref[...] * inv_n - mean * mean, 0.0)   # biased var, clamped
    scale = gamma_ref[...] * lax.rsqrt(var + EPS_BN)              # (1, H)
    shift = beta_ref[...] - mean * scale                          # (1, H)

    w_eff_t = wout_t_ref[...] * scale                             # lane-aligned BN fold
    dn = (((1,), (1,)), ((), ()))                                  # contract on H (rhs transposed)
    b_eff = bout_ref[...] + lax.dot_general(
        shift, wout_t_ref[...], dn, preferred_element_type=jnp.float32)
    logits_ref[...] = lax.dot_general(
        res_ref[...], w_eff_t, dn, preferred_element_type=jnp.float32) + b_eff


# --------------------------------------------------------------------------- #
# Wrapper
# --------------------------------------------------------------------------- #
def _pick_time_chunk(T, B, target_rows=512):
    """Largest TC dividing T with TC*B rows a multiple of 8 (sublane tile) <= target."""
    best = T
    for tc in range(1, T + 1):
        if T % tc == 0 and (tc * B) % 8 == 0 and tc * B <= target_rows:
            best = tc
    return best


def _pick_row_block(rows, target=512):
    best = rows
    for rb in range(8, rows + 1, 8):
        if rows % rb == 0 and rb <= target:
            best = rb
    return best


def _vmem_limit(nbytes):
    # Generous headroom, but capped at 48 MiB to stay under v7x's 64 MiB per-TC VMEM.
    return int(min(max(4 * nbytes, 16 * 1024 * 1024), 48 * 1024 * 1024))


def lstm_classifier_forward(x, state, params, *, time_chunk=None, head_rows=None):
    """x: (B, T, F) float32; state: (h0, c0) each (1, B, H).
    Returns (logits (B, T, C), (h_new (1, B, H), c_new (1, B, H)))."""
    B, T, F = x.shape
    H = state[0].shape[-1]
    C = params["w_out"].shape[-1]
    Cp = ((C + 127) // 128) * 128                 # lane-dense padded class dim

    # Encoder Linear fused into the LSTM input projection (exact: both affine).
    w_x = (params["w_enc"] @ params["w_ih"]).astype(jnp.bfloat16)              # (F, 4H)
    b_x = params["b_enc"] @ params["w_ih"] + params["b_ih"] + params["b_hh"]   # (1, 4H)
    whh = params["w_hh"].astype(jnp.bfloat16)                                  # (H, 4H)

    # Classifier weight transposed + zero-padded so the BN fold is a lane
    # broadcast and the logits store is lane-dense.
    w_out_t = jnp.zeros((Cp, H), jnp.float32).at[:C, :].set(params["w_out"].T)
    b_out_p = jnp.zeros((1, Cp), jnp.float32).at[:, :C].set(params["b_out"])

    # Time-major lane-dense rows: row index = t*B + b.
    x2 = jnp.transpose(x, (1, 0, 2)).reshape(T * B, F).astype(jnp.float32)
    h0 = state[0][0].astype(jnp.float32)
    c0 = state[1][0].astype(jnp.float32)

    TC = _pick_time_chunk(T, B) if time_chunk is None else time_chunk
    assert T % TC == 0, "time_chunk must divide T"
    rows_chunk = TC * B
    RB = _pick_row_block(T * B) if head_rows is None else head_rows
    assert (T * B) % RB == 0, "head_rows must divide T*B"

    # ---- Pass 1: LSTM over time chunks --------------------------------------
    vmem1 = _vmem_limit(
        2 * rows_chunk * F * 4 + w_x.size * 2 + b_x.size * 4 + whh.size * 2
        + 4 * B * H * 4 + 2 * rows_chunk * H * 4 + 2 * H * 4
        + TC * max(B, 8) * 4 * H * 4)
    res, h_fin, c_fin, s_sum, q_sum = pl.pallas_call(
        lstm_chunk_kernel,
        out_shape=(
            jax.ShapeDtypeStruct((T * B, H), jnp.float32),
            jax.ShapeDtypeStruct((B, H), jnp.float32),
            jax.ShapeDtypeStruct((B, H), jnp.float32),
            jax.ShapeDtypeStruct((1, H), jnp.float32),
            jax.ShapeDtypeStruct((1, H), jnp.float32),
        ),
        grid_spec=pltpu.PrefetchScalarGridSpec(
            num_scalar_prefetch=0,
            grid=(T // TC,),
            in_specs=[
                pl.BlockSpec((rows_chunk, F), lambda n: (n, 0)),
                pl.BlockSpec((B, H), lambda n: (0, 0)),
                pl.BlockSpec((B, H), lambda n: (0, 0)),
                pl.BlockSpec((F, 4 * H), lambda n: (0, 0)),
                pl.BlockSpec((1, 4 * H), lambda n: (0, 0)),
                pl.BlockSpec((H, 4 * H), lambda n: (0, 0)),
            ],
            out_specs=(
                pl.BlockSpec((rows_chunk, H), lambda n: (n, 0)),
                pl.BlockSpec((B, H), lambda n: (0, 0)),
                pl.BlockSpec((B, H), lambda n: (0, 0)),
                pl.BlockSpec((1, H), lambda n: (0, 0)),
                pl.BlockSpec((1, H), lambda n: (0, 0)),
            ),
            scratch_shapes=[pltpu.VMEM((TC, B, 4 * H), jnp.float32)],
        ),
        compiler_params=pltpu.CompilerParams(
            dimension_semantics=("arbitrary",),      # sequential carry over time
            vmem_limit_bytes=vmem1),
    )(x2, h0, c0, w_x, b_x, whh)

    # ---- Pass 2: BN-folded classifier head over row blocks ------------------
    vmem2 = _vmem_limit(
        2 * RB * H * 4 + 4 * H * 4 + Cp * H * 4 + Cp * 4 + 2 * RB * Cp * 4)
    logits_p = pl.pallas_call(
        functools.partial(bn_head_kernel, inv_n=1.0 / float(T * B)),
        out_shape=jax.ShapeDtypeStruct((T * B, Cp), jnp.float32),
        grid_spec=pltpu.PrefetchScalarGridSpec(
            num_scalar_prefetch=0,
            grid=((T * B) // RB,),
            in_specs=[
                pl.BlockSpec((RB, H), lambda r: (r, 0)),
                pl.BlockSpec((1, H), lambda r: (0, 0)),
                pl.BlockSpec((1, H), lambda r: (0, 0)),
                pl.BlockSpec((1, H), lambda r: (0, 0)),
                pl.BlockSpec((1, H), lambda r: (0, 0)),
                pl.BlockSpec((Cp, H), lambda r: (0, 0)),
                pl.BlockSpec((1, Cp), lambda r: (0, 0)),
            ],
            out_specs=pl.BlockSpec((RB, Cp), lambda r: (r, 0)),
        ),
        compiler_params=pltpu.CompilerParams(
            dimension_semantics=("parallel",),       # row blocks are independent
            vmem_limit_bytes=vmem2),
    )(res, s_sum, q_sum, params["gamma"], params["beta"], w_out_t, b_out_p)

    logits = jnp.transpose(logits_p[:, :C].reshape(T, B, C), (1, 0, 2))  # (B, T, C)
    return logits, (h_fin[None], c_fin[None])


# --------------------------------------------------------------------------- #
# Pure-JAX reference (mirrors the PyTorch forward) and parameter construction
# --------------------------------------------------------------------------- #
def reference_forward(x, state, params):
    B, T, F = x.shape
    H = state[0].shape[-1]
    emb = x.reshape(B * T, F) @ params["w_enc"] + params["b_enc"]
    emb = emb.reshape(B, T, -1)
    h, c = state[0][0], state[1][0]
    outs = []
    for t in range(T):
        gates = (emb[:, t] @ params["w_ih"] + h @ params["w_hh"]
                 + params["b_ih"] + params["b_hh"])
        i_g = jax.nn.sigmoid(gates[:, :H])
        f_g = jax.nn.sigmoid(gates[:, H:2 * H])
        g_g = jnp.tanh(gates[:, 2 * H:3 * H])
        o_g = jax.nn.sigmoid(gates[:, 3 * H:])
        c = f_g * c + i_g * g_g
        h = o_g * jnp.tanh(c)
        outs.append(h)
    res = jnp.stack(outs, axis=1).reshape(B * T, H)
    mean = res.mean(axis=0, keepdims=True)
    var = ((res - mean) ** 2).mean(axis=0, keepdims=True)
    normed = (res - mean) / jnp.sqrt(var + EPS_BN) * params["gamma"] + params["beta"]
    logits = (normed @ params["w_out"] + params["b_out"]).reshape(B, T, -1)
    return logits, (h[None], c[None])


def make_params(key, feat, emb_dim, hidden, n_cls):
    ks = jax.random.split(key, 10)
    s = 0.1
    return {
        "w_enc": s * jax.random.normal(ks[0], (feat, emb_dim), jnp.float32),
        "b_enc": s * jax.random.normal(ks[1], (1, emb_dim), jnp.float32),
        "w_ih": s * jax.random.normal(ks[2], (emb_dim, 4 * hidden), jnp.float32),
        "b_ih": s * jax.random.normal(ks[3], (1, 4 * hidden), jnp.float32),
        "w_hh": s * jax.random.normal(ks[4], (hidden, 4 * hidden), jnp.float32),
        "b_hh": s * jax.random.normal(ks[5], (1, 4 * hidden), jnp.float32),
        "gamma": 1.0 + s * jax.random.normal(ks[6], (1, hidden), jnp.float32),
        "beta": s * jax.random.normal(ks[7], (1, hidden), jnp.float32),
        "w_out": s * jax.random.normal(ks[8], (hidden, n_cls), jnp.float32),
        "b_out": s * jax.random.normal(ks[9], (1, n_cls), jnp.float32),
    }


if __name__ == "__main__":
    B, T, F = 2, 8, 16       # batch, sequence length, raw feature dim
    EMB, H, C = 128, 32, 5   # encoder output (LSTM input_size=128), hidden, classes

    root = jax.random.PRNGKey(0)
    k_x, k_h, k_c, k_p = jax.random.split(root, 4)

    x = jax.random.normal(k_x, (B, T, F), jnp.float32)
    state = (jax.random.normal(k_h, (1, B, H), jnp.float32),   # init_state: randn
             jax.random.normal(k_c, (1, B, H), jnp.float32))
    params = make_params(k_p, F, EMB, H, C)

    # time_chunk=4 / head_rows=8 so both pallas grids have >1 step at these small
    # shapes (exercises the cross-chunk h/c carry and the parallel head pass).
    logits, (h_new, c_new) = lstm_classifier_forward(
        x, state, params, time_chunk=4, head_rows=8)
    jax.block_until_ready((logits, h_new, c_new))

    assert logits.shape == (B, T, C)
    assert h_new.shape == (1, B, H) and c_new.shape == (1, B, H)

    ref_logits, (ref_h, ref_c) = reference_forward(x, state, params)
    # bf16 MXU operands (f32 accumulation & f32 h/c state) per the perf review ->
    # compare at a bf16-appropriate tolerance.
    assert jnp.allclose(logits, ref_logits, atol=2e-2, rtol=2e-2)
    assert jnp.allclose(h_new, ref_h, atol=2e-2, rtol=2e-2)
    assert jnp.allclose(c_new, ref_c, atol=2e-2, rtol=2e-2)

    print("KERNEL_OK")
</pallas_src>

<mosaic_0001>
module attributes {stable_mosaic.version = 11 : i64} {
  func.func @lstm_chunk_kernel(%arg0: i32, %arg1: memref<8x16xf32, #tpu.memory_space<vmem>>, %arg2: memref<2x32xf32, #tpu.memory_space<vmem>>, %arg3: memref<2x32xf32, #tpu.memory_space<vmem>>, %arg4: memref<16x128xbf16, #tpu.memory_space<vmem>>, %arg5: memref<1x128xf32, #tpu.memory_space<vmem>>, %arg6: memref<32x128xbf16, #tpu.memory_space<vmem>>, %arg7: memref<8x32xf32, #tpu.memory_space<vmem>>, %arg8: memref<2x32xf32, #tpu.memory_space<vmem>>, %arg9: memref<2x32xf32, #tpu.memory_space<vmem>>, %arg10: memref<1x32xf32, #tpu.memory_space<vmem>>, %arg11: memref<1x32xf32, #tpu.memory_space<vmem>>, %arg12: memref<4x2x128xf32, #tpu.memory_space<vmem>>) attributes {dimension_semantics = [#tpu.dimension_semantics<arbitrary>], iteration_bounds = array<i64: 2>, scalar_prefetch = 0 : i64, scratch_operands = 1 : i64, tpu.core_type = #tpu.core_type<tc>, window_params = [{transform_indices = @transform_0, window_bounds = array<i64: 8, 16>}, {pipeline_mode = #tpu.pipeline_mode<synchronous>, transform_indices = @transform_1, window_bounds = array<i64: 2, 32>}, {pipeline_mode = #tpu.pipeline_mode<synchronous>, transform_indices = @transform_2, window_bounds = array<i64: 2, 32>}, {pipeline_mode = #tpu.pipeline_mode<synchronous>, transform_indices = @transform_3, window_bounds = array<i64: 16, 128>}, {pipeline_mode = #tpu.pipeline_mode<synchronous>, transform_indices = @transform_4, window_bounds = array<i64: 1, 128>}, {pipeline_mode = #tpu.pipeline_mode<synchronous>, transform_indices = @transform_5, window_bounds = array<i64: 32, 128>}, {transform_indices = @transform_6, window_bounds = array<i64: 8, 32>}, {pipeline_mode = #tpu.pipeline_mode<synchronous>, transform_indices = @transform_7, window_bounds = array<i64: 2, 32>}, {pipeline_mode = #tpu.pipeline_mode<synchronous>, transform_indices = @transform_8, window_bounds = array<i64: 2, 32>}, {pipeline_mode = #tpu.pipeline_mode<synchronous>, transform_indices = @transform_9, window_bounds = array<i64: 1, 32>}, {pipeline_mode = #tpu.pipeline_mode<synchronous>, transform_indices = @transform_10, window_bounds = array<i64: 1, 32>}]} {
    %c0_i32 = arith.constant 0 : i32
    %0 = arith.cmpi eq, %arg0, %c0_i32 : i32
    %1 = arith.extui %0 : i1 to i32
    %c0_i32_0 = arith.constant 0 : i32
    %2 = arith.cmpi ne, %1, %c0_i32_0 : i32
    scf.if %2 {
      %c0_63 = arith.constant 0 : index
      %c0_64 = arith.constant 0 : index
      %139 = vector.load %arg2[%c0_63, %c0_64] : memref<2x32xf32, #tpu.memory_space<vmem>>, vector<2x32xf32>
      %c0_65 = arith.constant 0 : index
      %c0_66 = arith.constant 0 : index
      %140 = vector.load %arg8[%c0_65, %c0_66] : memref<2x32xf32, #tpu.memory_space<vmem>>, vector<2x32xf32>
      tpu.vector_store %arg8[%c0_65, %c0_66], %139 {strides = array<i32>} : memref<2x32xf32, #tpu.memory_space<vmem>>, vector<2x32xf32>,
      %c0_67 = arith.constant 0 : index
      %c0_68 = arith.constant 0 : index
      %141 = vector.load %arg3[%c0_67, %c0_68] : memref<2x32xf32, #tpu.memory_space<vmem>>, vector<2x32xf32>
      %c0_69 = arith.constant 0 : index
      %c0_70 = arith.constant 0 : index
      %142 = vector.load %arg9[%c0_69, %c0_70] : memref<2x32xf32, #tpu.memory_space<vmem>>, vector<2x32xf32>
      tpu.vector_store %arg9[%c0_69, %c0_70], %141 {strides = array<i32>} : memref<2x32xf32, #tpu.memory_space<vmem>>, vector<2x32xf32>,
      %cst_71 = arith.constant 0.000000e+00 : f32
      %143 = vector.broadcast %cst_71 : f32 to vector<1x32xf32>
      %c0_72 = arith.constant 0 : index
      %c0_73 = arith.constant 0 : index
      %144 = vector.load %arg10[%c0_72, %c0_73] : memref<1x32xf32, #tpu.memory_space<vmem>>, vector<1x32xf32>
      tpu.vector_store %arg10[%c0_72, %c0_73], %143 {strides = array<i32>} : memref<1x32xf32, #tpu.memory_space<vmem>>, vector<1x32xf32>,
      %cst_74 = arith.constant 0.000000e+00 : f32
      %145 = vector.broadcast %cst_74 : f32 to vector<1x32xf32>
      %c0_75 = arith.constant 0 : index
      %c0_76 = arith.constant 0 : index
      %146 = vector.load %arg11[%c0_75, %c0_76] : memref<1x32xf32, #tpu.memory_space<vmem>>, vector<1x32xf32>
      tpu.vector_store %arg11[%c0_75, %c0_76], %145 {strides = array<i32>} : memref<1x32xf32, #tpu.memory_space<vmem>>, vector<1x32xf32>,
    } else {
    }
    %c0 = arith.constant 0 : index
    %c0_1 = arith.constant 0 : index
    %3 = vector.load %arg1[%c0, %c0_1] : memref<8x16xf32, #tpu.memory_space<vmem>>, vector<8x16xf32>
    %4 = arith.truncf %3 : vector<8x16xf32> to vector<8x16xbf16>
    %c0_2 = arith.constant 0 : index
    %c0_3 = arith.constant 0 : index
    %5 = vector.load %arg4[%c0_2, %c0_3] : memref<16x128xbf16, #tpu.memory_space<vmem>>, vector<16x128xbf16>
    %cst = arith.constant dense<0.000000e+00> : vector<8x128xf32>
    %6 = tpu.matmul %4, %5, %cst {dimension_numbers = #tpu.dot_dimension_numbers<[1], [0], [0], [1], [0, 0, 1, 1], [], []>} : vector<8x16xbf16>, vector<16x128xbf16>, vector<8x128xf32> -> vector<8x128xf32>
    %c0_4 = arith.constant 0 : index
    %c0_5 = arith.constant 0 : index
    %7 = vector.load %arg5[%c0_4, %c0_5] : memref<1x128xf32, #tpu.memory_space<vmem>>, vector<1x128xf32>
    %8 = vector.broadcast %7 : vector<1x128xf32> to vector<8x128xf32>
    %9 = arith.addf %6, %8 : vector<8x128xf32>
    %10 = vector.extract_strided_slice %9 {offsets = [0, 0], sizes = [2, 128], strides = [1, 1]} : vector<8x128xf32> to vector<2x128xf32>
    %c0_6 = arith.constant 0 : index
    %c0_7 = arith.constant 0 : index
    %c0_8 = arith.constant 0 : index
    %11 = vector.load %arg12[%c0_6, %c0_7, %c0_8] : memref<4x2x128xf32, #tpu.memory_space<vmem>>, vector<1x2x128xf32>
    %12 = vector.shape_cast %11 : vector<1x2x128xf32> to vector<2x128xf32>
    %13 = vector.shape_cast %10 : vector<2x128xf32> to vector<1x2x128xf32>
    tpu.vector_store %arg12[%c0_6, %c0_7, %c0_8], %13 {strides = array<i32>} : memref<4x2x128xf32, #tpu.memory_space<vmem>>, vector<1x2x128xf32>,
    %14 = vector.extract_strided_slice %9 {offsets = [2, 0], sizes = [2, 128], strides = [1, 1]} : vector<8x128xf32> to vector<2x128xf32>
    %c1 = arith.constant 1 : index
    %c0_9 = arith.constant 0 : index
    %c0_10 = arith.constant 0 : index
    %15 = vector.load %arg12[%c1, %c0_9, %c0_10] : memref<4x2x128xf32, #tpu.memory_space<vmem>>, vector<1x2x128xf32>
    %16 = vector.shape_cast %15 : vector<1x2x128xf32> to vector<2x128xf32>
    %17 = vector.shape_cast %14 : vector<2x128xf32> to vector<1x2x128xf32>
    tpu.vector_store %arg12[%c1, %c0_9, %c0_10], %17 {strides = array<i32>} : memref<4x2x128xf32, #tpu.memory_space<vmem>>, vector<1x2x128xf32>,
    %18 = vector.extract_strided_slice %9 {offsets = [4, 0], sizes = [2, 128], strides = [1, 1]} : vector<8x128xf32> to vector<2x128xf32>
    %c2 = arith.constant 2 : index
    %c0_11 = arith.constant 0 : index
    %c0_12 = arith.constant 0 : index
    %19 = vector.load %arg12[%c2, %c0_11, %c0_12] : memref<4x2x128xf32, #tpu.memory_space<vmem>>, vector<1x2x128xf32>
    %20 = vector.shape_cast %19 : vector<1x2x128xf32> to vector<2x128xf32>
    %21 = vector.shape_cast %18 : vector<2x128xf32> to vector<1x2x128xf32>
    tpu.vector_store %arg12[%c2, %c0_11, %c0_12], %21 {strides = array<i32>} : memref<4x2x128xf32, #tpu.memory_space<vmem>>, vector<1x2x128xf32>,
    %22 = vector.extract_strided_slice %9 {offsets = [6, 0], sizes = [2, 128], strides = [1, 1]} : vector<8x128xf32> to vector<2x128xf32>
    %c3 = arith.constant 3 : index
    %c0_13 = arith.constant 0 : index
    %c0_14 = arith.constant 0 : index
    %23 = vector.load %arg12[%c3, %c0_13, %c0_14] : memref<4x2x128xf32, #tpu.memory_space<vmem>>, vector<1x2x128xf32>
    %24 = vector.shape_cast %23 : vector<1x2x128xf32> to vector<2x128xf32>
    %25 = vector.shape_cast %22 : vector<2x128xf32> to vector<1x2x128xf32>
    tpu.vector_store %arg12[%c3, %c0_13, %c0_14], %25 {strides = array<i32>} : memref<4x2x128xf32, #tpu.memory_space<vmem>>, vector<1x2x128xf32>,
    %c0_15 = arith.constant 0 : index
    %c0_16 = arith.constant 0 : index
    %26 = vector.load %arg6[%c0_15, %c0_16] : memref<32x128xbf16, #tpu.memory_space<vmem>>, vector<32x128xbf16>
    %c0_17 = arith.constant 0 : index
    %c0_18 = arith.constant 0 : index
    %27 = vector.load %arg8[%c0_17, %c0_18] : memref<2x32xf32, #tpu.memory_space<vmem>>, vector<2x32xf32>
    %c0_19 = arith.constant 0 : index
    %c0_20 = arith.constant 0 : index
    %28 = vector.load %arg9[%c0_19, %c0_20] : memref<2x32xf32, #tpu.memory_space<vmem>>, vector<2x32xf32>
    %cst_21 = arith.constant 0.000000e+00 : f32
    %29 = vector.broadcast %cst_21 : f32 to vector<2x32xf32>
    %cst_22 = arith.constant 0.000000e+00 : f32
    %30 = vector.broadcast %cst_22 : f32 to vector<2x32xf32>
    %c0_23 = arith.constant 0 : index
    %c0_24 = arith.constant 0 : index
    %c0_25 = arith.constant 0 : index
    %31 = vector.load %arg12[%c0_23, %c0_24, %c0_25] : memref<4x2x128xf32, #tpu.memory_space<vmem>>, vector<1x2x128xf32>
    %32 = vector.shape_cast %31 : vector<1x2x128xf32> to vector<2x128xf32>
    %33 = arith.truncf %27 : vector<2x32xf32> to vector<2x32xbf16>
    %cst_26 = arith.constant dense<0.000000e+00> : vector<2x128xf32>
    %34 = tpu.matmul %33, %26, %cst_26 {dimension_numbers = #tpu.dot_dimension_numbers<[1], [0], [0], [1], [0, 0, 1, 1], [], []>} : vector<2x32xbf16>, vector<32x128xbf16>, vector<2x128xf32> -> vector<2x128xf32>
    %35 = arith.addf %32, %34 : vector<2x128xf32>
    %36 = arith.negf %35 : vector<2x128xf32>
    %37 = math.exp %36 : vector<2x128xf32>
    %cst_27 = arith.constant 1.000000e+00 : f32
    %38 = vector.broadcast %cst_27 : f32 to vector<2x128xf32>
    %39 = arith.addf %38, %37 : vector<2x128xf32>
    %40 = arith.divf %38, %39 : vector<2x128xf32>
    %41 = math.tanh %35 : vector<2x128xf32>
    %42 = vector.extract_strided_slice %40 {offsets = [0, 0], sizes = [2, 32], strides = [1, 1]} : vector<2x128xf32> to vector<2x32xf32>
    %43 = vector.extract_strided_slice %40 {offsets = [0, 32], sizes = [2, 32], strides = [1, 1]} : vector<2x128xf32> to vector<2x32xf32>
    %44 = vector.extract_strided_slice %41 {offsets = [0, 64], sizes = [2, 32], strides = [1, 1]} : vector<2x128xf32> to vector<2x32xf32>
    %45 = vector.extract_strided_slice %40 {offsets = [0, 96], sizes = [2, 32], strides = [1, 1]} : vector<2x128xf32> to vector<2x32xf32>
    %46 = arith.mulf %43, %28 : vector<2x32xf32>
    %47 = arith.mulf %42, %44 : vector<2x32xf32>
    %48 = arith.addf %46, %47 : vector<2x32xf32>
    %49 = math.tanh %48 : vector<2x32xf32>
    %50 = arith.mulf %45, %49 : vector<2x32xf32>
    %c0_28 = arith.constant 0 : index
    %c0_29 = arith.constant 0 : index
    %51 = vector.load %arg7[%c0_28, %c0_29] : memref<8x32xf32, #tpu.memory_space<vmem>>, vector<2x32xf32>
    tpu.vector_store %arg7[%c0_28, %c0_29], %50 {strides = array<i32>} : memref<8x32xf32, #tpu.memory_space<vmem>>, vector<2x32xf32>,
    %52 = arith.addf %29, %50 : vector<2x32xf32>
    %53 = arith.mulf %50, %50 : vector<2x32xf32>
    %54 = arith.addf %30, %53 : vector<2x32xf32>
    %c1_30 = arith.constant 1 : index
    %c0_31 = arith.constant 0 : index
    %c0_32 = arith.constant 0 : index
    %55 = vector.load %arg12[%c1_30, %c0_31, %c0_32] : memref<4x2x128xf32, #tpu.memory_space<vmem>>, vector<1x2x128xf32>
    %56 = vector.shape_cast %55 : vector<1x2x128xf32> to vector<2x128xf32>
    %57 = arith.truncf %50 : vector<2x32xf32> to vector<2x32xbf16>
    %cst_33 = arith.constant dense<0.000000e+00> : vector<2x128xf32>
    %58 = tpu.matmul %57, %26, %cst_33 {dimension_numbers = #tpu.dot_dimension_numbers<[1], [0], [0], [1], [0, 0, 1, 1], [], []>} : vector<2x32xbf16>, vector<32x128xbf16>, vector<2x128xf32> -> vector<2x128xf32>
    %59 = arith.addf %56, %58 : vector<2x128xf32>
    %60 = arith.negf %59 : vector<2x128xf32>
    %61 = math.exp %60 : vector<2x128xf32>
    %cst_34 = arith.constant 1.000000e+00 : f32
    %62 = vector.broadcast %cst_34 : f32 to vector<2x128xf32>
    %63 = arith.addf %62, %61 : vector<2x128xf32>
    %64 = arith.divf %62, %63 : vector<2x128xf32>
    %65 = math.tanh %59 : vector<2x128xf32>
    %66 = vector.extract_strided_slice %64 {offsets = [0, 0], sizes = [2, 32], strides = [1, 1]} : vector<2x128xf32> to vector<2x32xf32>
    %67 = vector.extract_strided_slice %64 {offsets = [0, 32], sizes = [2, 32], strides = [1, 1]} : vector<2x128xf32> to vector<2x32xf32>
    %68 = vector.extract_strided_slice %65 {offsets = [0, 64], sizes = [2, 32], strides = [1, 1]} : vector<2x128xf32> to vector<2x32xf32>
    %69 = vector.extract_strided_slice %64 {offsets = [0, 96], sizes = [2, 32], strides = [1, 1]} : vector<2x128xf32> to vector<2x32xf32>
    %70 = arith.mulf %67, %48 : vector<2x32xf32>
    %71 = arith.mulf %66, %68 : vector<2x32xf32>
    %72 = arith.addf %70, %71 : vector<2x32xf32>
    %73 = math.tanh %72 : vector<2x32xf32>
    %74 = arith.mulf %69, %73 : vector<2x32xf32>
    %c2_35 = arith.constant 2 : index
    %c0_36 = arith.constant 0 : index
    %75 = vector.load %arg7[%c2_35, %c0_36] : memref<8x32xf32, #tpu.memory_space<vmem>>, vector<2x32xf32>
    tpu.vector_store %arg7[%c2_35, %c0_36], %74 {strides = array<i32>} : memref<8x32xf32, #tpu.memory_space<vmem>>, vector<2x32xf32>,
    %76 = arith.addf %52, %74 : vector<2x32xf32>
    %77 = arith.mulf %74, %74 : vector<2x32xf32>
    %78 = arith.addf %54, %77 : vector<2x32xf32>
    %c2_37 = arith.constant 2 : index
    %c0_38 = arith.constant 0 : index
    %c0_39 = arith.constant 0 : index
    %79 = vector.load %arg12[%c2_37, %c0_38, %c0_39] : memref<4x2x128xf32, #tpu.memory_space<vmem>>, vector<1x2x128xf32>
    %80 = vector.shape_cast %79 : vector<1x2x128xf32> to vector<2x128xf32>
    %81 = arith.truncf %74 : vector<2x32xf32> to vector<2x32xbf16>
    %cst_40 = arith.constant dense<0.000000e+00> : vector<2x128xf32>
    %82 = tpu.matmul %81, %26, %cst_40 {dimension_numbers = #tpu.dot_dimension_numbers<[1], [0], [0], [1], [0, 0, 1, 1], [], []>} : vector<2x32xbf16>, vector<32x128xbf16>, vector<2x128xf32> -> vector<2x128xf32>
    %83 = arith.addf %80, %82 : vector<2x128xf32>
    %84 = arith.negf %83 : vector<2x128xf32>
    %85 = math.exp %84 : vector<2x128xf32>
    %cst_41 = arith.constant 1.000000e+00 : f32
    %86 = vector.broadcast %cst_41 : f32 to vector<2x128xf32>
    %87 = arith.addf %86, %85 : vector<2x128xf32>
    %88 = arith.divf %86, %87 : vector<2x128xf32>
    %89 = math.tanh %83 : vector<2x128xf32>
    %90 = vector.extract_strided_slice %88 {offsets = [0, 0], sizes = [2, 32], strides = [1, 1]} : vector<2x128xf32> to vector<2x32xf32>
    %91 = vector.extract_strided_slice %88 {offsets = [0, 32], sizes = [2, 32], strides = [1, 1]} : vector<2x128xf32> to vector<2x32xf32>
    %92 = vector.extract_strided_slice %89 {offsets = [0, 64], sizes = [2, 32], strides = [1, 1]} : vector<2x128xf32> to vector<2x32xf32>
    %93 = vector.extract_strided_slice %88 {offsets = [0, 96], sizes = [2, 32], strides = [1, 1]} : vector<2x128xf32> to vector<2x32xf32>
    %94 = arith.mulf %91, %72 : vector<2x32xf32>
    %95 = arith.mulf %90, %92 : vector<2x32xf32>
    %96 = arith.addf %94, %95 : vector<2x32xf32>
    %97 = math.tanh %96 : vector<2x32xf32>
    %98 = arith.mulf %93, %97 : vector<2x32xf32>
    %c4 = arith.constant 4 : index
    %c0_42 = arith.constant 0 : index
    %99 = vector.load %arg7[%c4, %c0_42] : memref<8x32xf32, #tpu.memory_space<vmem>>, vector<2x32xf32>
    tpu.vector_store %arg7[%c4, %c0_42], %98 {strides = array<i32>} : memref<8x32xf32, #tpu.memory_space<vmem>>, vector<2x32xf32>,
    %100 = arith.addf %76, %98 : vector<2x32xf32>
    %101 = arith.mulf %98, %98 : vector<2x32xf32>
    %102 = arith.addf %78, %101 : vector<2x32xf32>
    %c3_43 = arith.constant 3 : index
    %c0_44 = arith.constant 0 : index
    %c0_45 = arith.constant 0 : index
    %103 = vector.load %arg12[%c3_43, %c0_44, %c0_45] : memref<4x2x128xf32, #tpu.memory_space<vmem>>, vector<1x2x128xf32>
    %104 = vector.shape_cast %103 : vector<1x2x128xf32> to vector<2x128xf32>
    %105 = arith.truncf %98 : vector<2x32xf32> to vector<2x32xbf16>
    %cst_46 = arith.constant dense<0.000000e+00> : vector<2x128xf32>
    %106 = tpu.matmul %105, %26, %cst_46 {dimension_numbers = #tpu.dot_dimension_numbers<[1], [0], [0], [1], [0, 0, 1, 1], [], []>} : vector<2x32xbf16>, vector<32x128xbf16>, vector<2x128xf32> -> vector<2x128xf32>
    %107 = arith.addf %104, %106 : vector<2x128xf32>
    %108 = arith.negf %107 : vector<2x128xf32>
    %109 = math.exp %108 : vector<2x128xf32>
    %cst_47 = arith.constant 1.000000e+00 : f32
    %110 = vector.broadcast %cst_47 : f32 to vector<2x128xf32>
    %111 = arith.addf %110, %109 : vector<2x128xf32>
    %112 = arith.divf %110, %111 : vector<2x128xf32>
    %113 = math.tanh %107 : vector<2x128xf32>
    %114 = vector.extract_strided_slice %112 {offsets = [0, 0], sizes = [2, 32], strides = [1, 1]} : vector<2x128xf32> to vector<2x32xf32>
    %115 = vector.extract_strided_slice %112 {offsets = [0, 32], sizes = [2, 32], strides = [1, 1]} : vector<2x128xf32> to vector<2x32xf32>
    %116 = vector.extract_strided_slice %113 {offsets = [0, 64], sizes = [2, 32], strides = [1, 1]} : vector<2x128xf32> to vector<2x32xf32>
    %117 = vector.extract_strided_slice %112 {offsets = [0, 96], sizes = [2, 32], strides = [1, 1]} : vector<2x128xf32> to vector<2x32xf32>
    %118 = arith.mulf %115, %96 : vector<2x32xf32>
    %119 = arith.mulf %114, %116 : vector<2x32xf32>
    %120 = arith.addf %118, %119 : vector<2x32xf32>
    %121 = math.tanh %120 : vector<2x32xf32>
    %122 = arith.mulf %117, %121 : vector<2x32xf32>
    %c6 = arith.constant 6 : index
    %c0_48 = arith.constant 0 : index
    %123 = vector.load %arg7[%c6, %c0_48] : memref<8x32xf32, #tpu.memory_space<vmem>>, vector<2x32xf32>
    tpu.vector_store %arg7[%c6, %c0_48], %122 {strides = array<i32>} : memref<8x32xf32, #tpu.memory_space<vmem>>, vector<2x32xf32>,
    %124 = arith.addf %100, %122 : vector<2x32xf32>
    %125 = arith.mulf %122, %122 : vector<2x32xf32>
    %126 = arith.addf %102, %125 : vector<2x32xf32>
    %c0_49 = arith.constant 0 : index
    %c0_50 = arith.constant 0 : index
    %127 = vector.load %arg8[%c0_49, %c0_50] : memref<2x32xf32, #tpu.memory_space<vmem>>, vector<2x32xf32>
    tpu.vector_store %arg8[%c0_49, %c0_50], %122 {strides = array<i32>} : memref<2x32xf32, #tpu.memory_space<vmem>>, vector<2x32xf32>,
    %c0_51 = arith.constant 0 : index
    %c0_52 = arith.constant 0 : index
    %128 = vector.load %arg9[%c0_51, %c0_52] : memref<2x32xf32, #tpu.memory_space<vmem>>, vector<2x32xf32>
    tpu.vector_store %arg9[%c0_51, %c0_52], %120 {strides = array<i32>} : memref<2x32xf32, #tpu.memory_space<vmem>>, vector<2x32xf32>,
    %c0_53 = arith.constant 0 : index
    %c0_54 = arith.constant 0 : index
    %129 = vector.load %arg10[%c0_53, %c0_54] : memref<1x32xf32, #tpu.memory_space<vmem>>, vector<1x32xf32>
    %cst_55 = arith.constant dense<0.000000e+00> : vector<32xf32>
    %130 = vector.multi_reduction <add>, %124, %cst_55 [0] : vector<2x32xf32> to vector<32xf32>
    %131 = vector.shape_cast %130 : vector<32xf32> to vector<1x32xf32>
    %132 = arith.addf %129, %131 : vector<1x32xf32>
    %c0_56 = arith.constant 0 : index
    %c0_57 = arith.constant 0 : index
    %133 = vector.load %arg10[%c0_56, %c0_57] : memref<1x32xf32, #tpu.memory_space<vmem>>, vector<1x32xf32>
    tpu.vector_store %arg10[%c0_56, %c0_57], %132 {strides = array<i32>} : memref<1x32xf32, #tpu.memory_space<vmem>>, vector<1x32xf32>,
    %c0_58 = arith.constant 0 : index
    %c0_59 = arith.constant 0 : index
    %134 = vector.load %arg11[%c0_58, %c0_59] : memref<1x32xf32, #tpu.memory_space<vmem>>, vector<1x32xf32>
    %cst_60 = arith.constant dense<0.000000e+00> : vector<32xf32>
    %135 = vector.multi_reduction <add>, %126, %cst_60 [0] : vector<2x32xf32> to vector<32xf32>
    %136 = vector.shape_cast %135 : vector<32xf32> to vector<1x32xf32>
    %137 = arith.addf %134, %136 : vector<1x32xf32>
    %c0_61 = arith.constant 0 : index
    %c0_62 = arith.constant 0 : index
    %138 = vector.load %arg11[%c0_61, %c0_62] : memref<1x32xf32, #tpu.memory_space<vmem>>, vector<1x32xf32>
    tpu.vector_store %arg11[%c0_61, %c0_62], %137 {strides = array<i32>} : memref<1x32xf32, #tpu.memory_space<vmem>>, vector<1x32xf32>,
    return
  }
  func.func @transform_0(%arg0: i32) -> (i32, i32) {
    %c0_i32 = arith.constant 0 : i32
    %c0_i32_0 = arith.constant 0 : i32
    return %arg0, %c0_i32 : i32, i32
  }
  func.func @transform_1(%arg0: i32) -> (i32, i32) {
    %c0_i32 = arith.constant 0 : i32
    %c0_i32_0 = arith.constant 0 : i32
    %c0_i32_1 = arith.constant 0 : i32
    return %c0_i32, %c0_i32_0 : i32, i32
  }
  func.func @transform_2(%arg0: i32) -> (i32, i32) {
    %c0_i32 = arith.constant 0 : i32
    %c0_i32_0 = arith.constant 0 : i32
    %c0_i32_1 = arith.constant 0 : i32
    return %c0_i32, %c0_i32_0 : i32, i32
  }
  func.func @transform_3(%arg0: i32) -> (i32, i32) {
    %c0_i32 = arith.constant 0 : i32
    %c0_i32_0 = arith.constant 0 : i32
    %c0_i32_1 = arith.constant 0 : i32
    return %c0_i32, %c0_i32_0 : i32, i32
  }
  func.func @transform_4(%arg0: i32) -> (i32, i32) {
    %c0_i32 = arith.constant 0 : i32
    %c0_i32_0 = arith.constant 0 : i32
    %c0_i32_1 = arith.constant 0 : i32
    return %c0_i32, %c0_i32_0 : i32, i32
  }
  func.func @transform_5(%arg0: i32) -> (i32, i32) {
    %c0_i32 = arith.constant 0 : i32
    %c0_i32_0 = arith.constant 0 : i32
    %c0_i32_1 = arith.constant 0 : i32
    return %c0_i32, %c0_i32_0 : i32, i32
  }
  func.func @transform_6(%arg0: i32) -> (i32, i32) {
    %c0_i32 = arith.constant 0 : i32
    %c0_i32_0 = arith.constant 0 : i32
    return %arg0, %c0_i32 : i32, i32
  }
  func.func @transform_7(%arg0: i32) -> (i32, i32) {
    %c0_i32 = arith.constant 0 : i32
    %c0_i32_0 = arith.constant 0 : i32
    %c0_i32_1 = arith.constant 0 : i32
    return %c0_i32, %c0_i32_0 : i32, i32
  }
  func.func @transform_8(%arg0: i32) -> (i32, i32) {
    %c0_i32 = arith.constant 0 : i32
    %c0_i32_0 = arith.constant 0 : i32
    %c0_i32_1 = arith.constant 0 : i32
    return %c0_i32, %c0_i32_0 : i32, i32
  }
  func.func @transform_9(%arg0: i32) -> (i32, i32) {
    %c0_i32 = arith.constant 0 : i32
    %c0_i32_0 = arith.constant 0 : i32
    %c0_i32_1 = arith.constant 0 : i32
    return %c0_i32, %c0_i32_0 : i32, i32
  }
  func.func @transform_10(%arg0: i32) -> (i32, i32) {
    %c0_i32 = arith.constant 0 : i32
    %c0_i32_0 = arith.constant 0 : i32
    %c0_i32_1 = arith.constant 0 : i32
    return %c0_i32, %c0_i32_0 : i32, i32
  }
}

</mosaic_0001>

<bundles_post_ra>
// kernel: tpu_custom_call.1
= control target key start
LH: loop header
LB: loop body
LE: loop exit
PB: predicated region body
PF: predicated region fallthrough
CT: control target
= control target key end

     0   :  { %s2033_s0 = inlined_call_operand.hbm [shape: f32[16,16], index: 0, kind: input, shape index: {}]   ;;  %s2034_s1 = inlined_call_operand.hbm [shape: f32[2,32], index: 1, kind: input, shape index: {}]   ;;  %s2035_s2 = inlined_call_operand.vmem [shape: f32[2,32], index: 2, kind: input, shape index: {}]   ;;  %s2036_s3 = inlined_call_operand.hbm [shape: bf16[16,128], index: 3, kind: input, shape index: {}]   ;;  %s2037_s4 = inlined_call_operand.vmem [shape: f32[1,128], index: 4, kind: input, shape index: {}]   ;;  %s2038_s5 = inlined_call_operand.hbm [shape: bf16[32,128], index: 5, kind: input, shape index: {}]   ;;  %s2039_s6 = inlined_call_operand.hbm [shape: f32[16,32], index: 6, kind: output, shape index: {0}]   ;;  %s2040_s7 = inlined_call_operand.hbm [shape: f32[2,32], index: 7, kind: output, shape index: {1}]   ;;  %s2041_s8 = inlined_call_operand.hbm [shape: f32[2,32], index: 8, kind: output, shape index: {2}]   ;;  %s2042_s9 = inlined_call_operand.hbm [shape: f32[1,32], index: 9, kind: output, shape index: {3}]   ;;  %s2043_s10 = inlined_call_operand.hbm [shape: f32[1,32], index: 10, kind: output, shape index: {4}]  }
   0x1   :  { %2049 = sst [smem:[#allocation26_spill]] %s2034_s1 }
   0x2   :  { %2050 = sst [smem:[#allocation27_spill]] %s2036_s3 }
   0x3   :  { %2051 = sst [smem:[#allocation28_spill]] %s2038_s5 }
   0x4   :  { %16 = vsyncpa [#allocation4], 0 }
   0x5   :  { %18 = vsyncpa [#allocation4 + $0x1], 0 }
   0x6   :  { %19 = vsyncpa [#allocation7], 0 }
   0x7   :  { %20 = vsyncpa [#allocation10], 0 }
   0x8   :  { %21 = vsyncpa [#allocation5], 0 }
   0x9   :  { %23 = vsyncpa [#allocation5 + $0x1], 0 }
   0xa   :  { %24 = vsyncpa [#allocation13], 0 }
   0xb   :  { %25 = vsyncpa [#allocation16], 0  ;;  %s1695_s13 = smov 0   ;;  %s1697_s14 = smov 0  }
   0xc   :  { %s1699_s15 = smov 0   ;;  %s1701_s16 = smov 0  }
   0xd LB: > { %2052 = sst [smem:[#allocation24_spill]] %s1616_s15  ;;  %s1716_s17 = sadd.s32 4294967295, %s1620_s16   ;;  %s1620_s16 = sphi %s1701_s16, %s2090_s16   ;;  %s1616_s15 = sphi %s1699_s15, %s2087_s15   ;;  %s1612_s14 = sphi %s1697_s14, %s2089_s14   ;;  %s1608_s13 = sphi %s1695_s13, %s2088_s13  }
   0xe   : > { %s1097_s18 = sadd.s32 4294967294, %s1620_s16   ;;  %p51_p0 = scmp.ne.s32.totalorder %s1612_s14, %s1608_s13 }
   0xf   : > { %p2044_p1 = scmp.eq.s32.totalorder %s1716_s17, 0  ;;  %p186_p3 = scmp.eq.s32.totalorder %s1097_s18, 1 }
  0x10   : > { %p1098_p5 = scmp.ge.s32.totalorder %s1620_s16, 1  ;;  %p277_p7 = scmp.lt.s32.totalorder %s1620_s16, 3 }
  0x11   : > { %p1725_p4 = por %p2044_p1, %p51_p0  ;;  %p1730_p6 = por %p186_p3, %p51_p0 }
  0x12   : > { %p1736_p9 = pnand %p1098_p5, %p277_p7  ;;  %s1622_s22 = smov [#allocation6]  }
  0x13   : > { %s2053_s19 = scalar_select %p1725_p4, 1, 0 }
  0x14   : > { %s2054_s20 = scalar_select %p1730_p6, 1, 0 }
  0x15   : > { %s2055_s21 = scalar_select %p1736_p9, 1, 0 }
  0x16   : > { %s290_s23 = sshll.u32 %s1622_s22, 4  ;;  %p1221_p11 = pneg %p1736_p9  ;;  %s291_s23 = int_to_ptr.vmem [resolvable:$true] %s290_s23 }
  0x17   : > { %s1623_s24 = smov [#allocation8]   ;;  %s1624_s27 = smov [#allocation9]  }
  0x18   : > { %s303_s25 = sshll.u32 %s1623_s24, 4  ;;  %p1745_p12 = pnand %p1221_p11, %p2044_p1  ;;  %s304_s25 = int_to_ptr.vmem [resolvable:$true] %s303_s25 }
  0x19   : > { %s319_s28 = sshll.u32 %s1624_s27, 4  ;;  %s1349_s29 = scalar_lea.vmem %s291_s23, 32  ;;  %s320_s28 = int_to_ptr.vmem [resolvable:$true] %s319_s28 }
  0x1a   : > { %p1340_p13 = pneg %p1745_p12  ;;  %p1350_p0 = scmp.ne.s32.totalorder %s291_s23, %s1349_s29 }
  0x1b   : > { %p1357_p7 = scmp.lt.s32.totalorder %s291_s23, %s291_s23  ;;  %p1358_p10 = scmp.lt.s32.totalorder %s1349_s29, %s1349_s29 }
  0x1c   : > { %p1352_p3 = pnand %p1350_p0, %p1340_p13 }
  0x1d   : > { %p1359_p8 = por %p1358_p10, %p1357_p7 }
  0x1e   : > { %p1353_p5 = pneg %p1352_p3 }
  0x20   : > { %p1360_p11 = pnand %p1359_p8, %p1353_p5 }
  0x22   : > { %1363 = shalt.err (!%p1360_p11)
}
  0x23   : > { %s2057_s1 = sld [smem:[#allocation26_spill]]  ;;  %s1375_s12 = scalar_lea.vmem %s304_s25, 128 }
  0x24   : > { %p1376_p1 = scmp.ne.s32.totalorder %s304_s25, %s1375_s12  ;;  %p1383_p0 = scmp.lt.s32.totalorder %s304_s25, %s304_s25 }
  0x25   : > { %p1384_p3 = scmp.lt.s32.totalorder %s1375_s12, %s1375_s12 }
  0x26   : > { %p1378_p2 = pnand %p1376_p1, %p1340_p13 }
  0x27   : > { %p1385_p4 = por %p1384_p3, %p1383_p0 }
  0x28   : > { %p1379_p6 = pneg %p1378_p2 }
  0x29   : > { %1224 = dma.hbm_to_vmem [thread:$0]  (!%p1745_p12), %s2057_s1, 32, %s291_s23, [#allocation7]  }
  0x2a   : > { %p1386_p9 = pnand %p1385_p4, %p1379_p6 }
  0x2c   : > { %1389 = shalt.err (!%p1386_p9)
}
  0x2d   : > { %s1625_s18 = smov 64   ;;  %s1626_s22 = smov 4  }
  0x2e   : > { %s2058_s3 = sld [smem:[#allocation27_spill]]  ;;  %s1401_s23 = scalar_lea.vmem %s320_s28, 256 }
  0x2f   : > { %p1402_p8 = scmp.ne.s32.totalorder %s320_s28, %s1401_s23  ;;  %p1409_p10 = scmp.lt.s32.totalorder %s320_s28, %s320_s28 }
  0x30   : > { %p1410_p5 = scmp.lt.s32.totalorder %s1401_s23, %s1401_s23 }
  0x31   : > { %p1404_p1 = pnand %p1402_p8, %p1340_p13 }
  0x32   : > { %p1411_p4 = por %p1410_p5, %p1409_p10 }
  0x33   : > { %p1405_p2 = pneg %p1404_p1 }
  0x34   : > { %1227 = dma.hbm_to_vmem [thread:$0]  (!%p1745_p12), %s2058_s3, 128, %s304_s25, [#allocation7], %s1625_s18, %s1625_s18, %s1626_s22  }
  0x35   : > { %p1412_p6 = pnand %p1411_p4, %p1405_p2 }
  0x37   : > { %1415 = shalt.err (!%p1412_p6)
}
  0x38   : > { %s2059_s5 = sld [smem:[#allocation28_spill]]  ;;  %s1776_s25 = sadd.s32 1, %s1620_s16  }
  0x39   : > { %s35_s11 = ssub.s32 %s1620_s16, %s1776_s25  ;;  %s38_s26 = sadd.s32 1, %s1616_s15 }
  0x3a   : > { %p36_p9 = scmp.eq.s32.totalorder %s35_s11, 0  ;;  %p45_p13 = scmp.ne.s32.totalorder %s1616_s15, %s1612_s14 }
  0x3b   : > { %p46_p7 = scmp.eq.s32.totalorder %s1620_s16, 0  ;;  %p1242_p11 = scmp.lt.s32.totalorder %s1620_s16, 2 }
  0x3c   : > { %s1786_s12 = scalar_select %p36_p9, %s1616_s15, %s38_s26  }
  0x3d   : > { %p47_p0 = por %p46_p7, %p45_p13  ;;  %p2061_p3 = scmp.eq.s32.totalorder %s1716_s17, 1 }
  0x3e   : > { %1230 = dma.hbm_to_vmem [thread:$0]  (!%p1745_p12), %s2059_s5, 256, %s320_s28, [#allocation10], %s1625_s18, %s1625_s18, %s1626_s22  }
  0x3f   : > { %2060 = sst [smem:[#allocation25_spill]] %s1786_s12  ;;  %p1790_p8 = por %p2061_p3, %p45_p13 }
  0x40   : > { %s333_s27 = sand.u32 1, %s1616_s15   ;;  %s1104_s23 = sshll.u32 %s1620_s16, 7 }
  0x41   : > { %s2062_s24 = scalar_select %p1790_p8, 1, 0 }
  0x42   : > { %s1103_s28 = sshll.u32 %s333_s27, 3  ;;  %s1799_s29 = scalar_lea.hbm %s2033_s0, %s1104_s23 }
  0x43   : > { %s337_s30 = scalar_lea.vmem [#allocation3], %s1103_s28  ;;  %p1801_p12 = pnand %p1242_p11, %p47_p0 }
  0x44   : > { %s344_s11 = sshll.u32 %s337_s30, 4  ;;  %s334_s1 = scalar_lea.sflag [#allocation4], %s333_s27  ;;  %s345_s11 = int_to_ptr.vmem [resolvable:$true] %s344_s11 }
  0x45   : > { %s1416_s3 = scalar_lea.hbm %s1799_s29, 128  ;;  %p1418_p2 = pneg %p1801_p12 }
  0x46   : > { %p1417_p1 = scmp.ne.s32.totalorder %s1799_s29, %s1416_s3  ;;  %s1421_s22 = scalar_lea.hbm %s2033_s0, 256 }
  0x47   : > { %p1422_p4 = scmp.lt.s32.totalorder %s1799_s29, %s2033_s0  ;;  %p1423_p6 = scmp.lt.s32.totalorder %s1421_s22, %s1416_s3 }
  0x48   : > { %p1419_p10 = pnand %p1418_p2, %p1417_p1 }
  0x49   : > { %p1424_p9 = por %p1423_p6, %p1422_p4 }
  0x4a   : > { %p1420_p5 = pneg %p1419_p10 }
  0x4c   : > { %p1425_p13 = pnand %p1424_p9, %p1420_p5 }
  0x4e   : > { %1428 = shalt.err (!%p1425_p13)
}
  0x4f   : > { %s1429_s30 = scalar_lea.vmem %s345_s11, 128  ;;  %s1627_s27 = smov [#allocation3]  }
  0x50   : > { %p1430_p7 = scmp.ne.s32.totalorder %s345_s11, %s1429_s30  ;;  %s1434_s12 = sshll.u32 %s1627_s27, 4  ;;  %s1435_s12 = int_to_ptr.vmem [resolvable:$false] %s1434_s12 }
  0x51   : > { %s1436_s15 = scalar_lea.vmem %s1435_s12, 256  ;;  %p1437_p3 = scmp.lt.s32.totalorder %s345_s11, %s1435_s12 }
  0x52   : > { %p1432_p11 = pnand %p1430_p7, %p1418_p2  ;;  %p1438_p1 = scmp.lt.s32.totalorder %s1436_s15, %s1429_s30 }
  0x54   : > { %p1433_p0 = pneg %p1432_p11  ;;  %p1439_p10 = por %p1438_p1, %p1437_p3 }
  0x56   : > { %p1440_p8 = pnand %p1439_p10, %p1433_p0 }
  0x58   : > { %1443 = shalt.err (!%p1440_p8)
}
  0x59   : > { %1234 = dma.hbm_to_vmem [thread:$0]  (!%p1801_p12), %s1799_s29, 128, %s345_s11, %s334_s1  }
  0x5a   : > { %p2064_p5 = scmp.ne.s32.totalorder %s2055_s21, 0 }
  0x5b   : > { %s1822_s3 = sand.u32 (!%p2064_p5), 1, %s1612_s14   ;;  %p2065_p2 = scmp.ne.s32.totalorder (!%p2064_p5), %s2053_s19, 0 }
  0x5c   : > { %353 = sbr.rel (%p2064_p5) target bundleno = 2970 (0xb9a), region = 44  ;;  %s1106_s5 = sshll.u32 (!%p2064_p5), %s1822_s3, 3 }
  0x5d   : > { %s356_s23 = scalar_lea.sflag (!%p2064_p5), [#allocation4], %s1822_s3  ;;  %s359_s12 = scalar_lea.vmem (!%p2064_p5), [#allocation3], %s1106_s5 }
  0x61   : > { %1583 = dma.done.wait (%p2065_p2), %s356_s23, 128  }
  0x62   : > { %1585 = vsyncadd (%p2065_p2), %s356_s23, 4294967168  ;;  %p2066_p8 = scmp.eq.s32.totalorder %s1716_s17, 0 }
  0x64   : > { %1587 = dma.done.wait (%p2066_p8), [#allocation7], 160   ;;  %p2067_p12 = pmov %p2066_p8 }
  0x65   : > { %p2068_p4 = pmov %p2066_p8 }
  0x66   : > { %1589 = vsyncadd (%p2067_p12), [#allocation7], 4294967136 }
  0x67   : > { %1591 = dma.done.wait (%p2068_p4), [#allocation10], 256   ;;  %p2069_p6 = pmov %p2068_p4 }
  0x68   : > { %s1838_s1 = scalar_lea.vmem [#allocation11], %s1106_s5  ;;  %p2070_p9 = scmp.ne.s32.totalorder %s1716_s17, 0 }
  0x69   : > { %1593 = vsyncadd (%p2069_p6), [#allocation10], 4294967040 }
  0x6a   : > { %412 = sbr.rel (%p2070_p9) target bundleno = 114 (0x72), region = 64 }
  0x6f   : > { %v413_v0 = vld [vmem:[#allocation6] sm:$0x3]  ;;  %vm414_vm0 = vcmask 254976   ;;  %v416_v1 = vld [vmem:[%s2035_s2] sm:$0x3]  ;;  %vm418_vm1 = vcmask 253952  }
  0x70   : > { %415 = vst.msk [vmem:[#allocation12] sm:$0x3] %vm414_vm0, %v413_v0  ;;  %417 = vst.msk [vmem:[#allocation14] sm:$0x3] %vm414_vm0, %v416_v1  ;;  %v1628_v2 = vmov 0.0  }
  0x71   : > { %419 = vst.msk [vmem:[#allocation15] sm:$0x1] %vm418_vm1, %v1628_v2  ;;  %420 = vst.msk [vmem:[#allocation17] sm:$0x1] %vm418_vm1, %v1628_v2 }
  0x72 PF: > { %v1303_v3 = vld [vmem:[#allocation8] sm:$0xff]   ;;  %v1629_v4 = vmov 0.0   ;;  %v1847_v5 = vld [vmem:[#allocation9 + $0x8] sm:$0xff]   ;;  %vm1630_vm2 = vmmov 0   ;;  %vm438_vm3 = vcmask 130048   ;;  %v1852_v8 = vld [vmem:[#allocation9] sm:$0xff]  }
  0x73   : > { %1151 = vmatprep.subr.bf16.mxu0 %v1629_v4  ;;  %1157 = vmatprep.subr.bf16.mxu1 %v1629_v4  ;;  %v421_v6 = vld [vmem:[%s359_s12] sm:$0xff]  ;;  %vm509_vm4 = vcmask 261120   ;;  %v1112_v11 = vld [vmem:[%s2037_s4] ss:$0 sm:$0xff]  ;;  %s1631_s11 = smov 64   ;;  %s1632_s26 = smov 32  }
  0x74   : > { %1152 = vmatpush3.bf16.msra.mxu0 %v1303_v3  ;;  %1153 = vmatprep.mubr.msk.bf16.mxu0 %vm1630_vm2, %v1629_v4  ;;  %v422_v7 = vpack.c.bf16 %v421_v6, %v421_v6  ;;  %vm586_vm5 = vcmask 254976   ;;  %vm841_vm6 = vcmask 1042176   ;;  %s1634_s18 = smov 96   ;;  %s1635_s22 = smov [#allocation12]  }
  0x75   : > { %1158 = vmatpush3.bf16.msra.mxu1 %v1847_v5  ;;  %1161 = vmatprep.mubr.msk.bf16.mxu1 %vm1630_vm2, %v1629_v4  ;;  %s923_s28 = sshll.u32 %s1635_s22, 4  ;;  %p2071_p7 = scmp.eq.s32.totalorder %s1716_s17, 1  ;;  %s924_s28 = int_to_ptr.vmem [resolvable:$true] %s923_s28 }
  0x76   : > { %1159 = vmatprep.subr.bf16.mxu1 %v1629_v4  ;;  %1165 = vmatprep.subr.bf16.mxu0 %v1629_v4  ;;  %s1444_s30 = scalar_lea.vmem %s924_s28, 32  ;;  %p1451_p3 = scmp.lt.s32.totalorder %s924_s28, %s924_s28 }
  0x77   : > { %v493_v9 = vld [vmem:[#allocation12] sm:$0x3]  ;;  %1154 = vmatmul.mubr.msk.bf16.vlgmr.msra.gmra.mxu0 %vm438_vm3, %v422_v7  ;;  %v494_v24 = vld [vmem:[#allocation14] sm:$0x3]  ;;  %p1445_p13 = scmp.ne.s32.totalorder %s924_s28, %s1444_s30  ;;  %p1452_p1 = scmp.lt.s32.totalorder %s1444_s30, %s1444_s30 }
  0x78   : > { %v496_v10 = vpack.c.bf16 %v493_v9, %v493_v9  ;;  %1166 = vmatpush3.bf16.msra.mxu0 %v1847_v5  ;;  %1169 = vmatprep.mubr.msk.bf16.mxu0 %vm1630_vm2, %v1629_v4 }
  0x79   : > { %1160 = vmatpush3.bf16.msra.mxu1 %v1852_v8  ;;  %1167 = vmatprep.subr.bf16.mxu0 %v1629_v4  ;;  %p1446_p11 = pnand %p1445_p13, %p2071_p7  ;;  %p1453_p10 = por %p1452_p1, %p1451_p3 }
  0x7a   : > { %1173 = vmatprep.subr.bf16.mxu1 %v1629_v4 }
  0x7b   : > { %p1447_p0 = pneg %p1446_p11 }
  0x7c   : > { %1162 = vmatmul.mubr.msk.bf16.vlgmr.msra.gmra.mxu1 %vm509_vm4, %v496_v10  ;;  %1168 = vmatpush3.bf16.msra.mxu0 %v1852_v8 }
  0x7d   : > { %1174 = vmatpush3.bf16.msra.mxu1 %v1847_v5  ;;  %1177 = vmatprep.mubr.msk.bf16.mxu1 %vm1630_vm2, %v1629_v4  ;;  %p1454_p5 = pnand %p1453_p10, %p1447_p0 }
  0x7e   : > { %1175 = vmatprep.subr.bf16.mxu1 %v1629_v4  ;;  %1181 = vmatprep.subr.bf16.mxu0 %v1629_v4 }
  0x81   : > { %1176 = vmatpush3.bf16.msra.mxu1 %v1852_v8 }
 0x137   : > { %v476_v12 = vpop.f32.mrf.mxu0 }
 0x138   : > { %v477_v13 = vadd.f32 %v1112_v11, %v476_v12 }
 0x139   : > { %v1155_v14 = vpop.f32.mrf.mxu0 }
 0x13a   : > { %482 = vst [vmem:[#allocation2] ss:$4 sps:$4 sm:$0xff] %v477_v13  }
 0x13b   : > { %v479_v15 = vpop.f32.mrf.mxu0 }
 0x13c   : > { %v547_v16 = vpop.f32.mrf.mxu1 }
 0x13d   : > { %v1156_v17 = vpop.f32.mrf.mxu0 }
 0x13e   : > { %v1163_v18 = vpop.f32.mrf.mxu1 }
 0x140   : > { %v550_v19 = vpop.f32.mrf.mxu1 }
 0x141   : > { %v495_v20 = vld [vmem:[#allocation2] sm:$0x3]  ;;  %v591_v40 = vld [vmem:[#allocation2 + $0x2] sm:$0x3]  ;;  %v672_v61 = vld [vmem:[#allocation2 + $0x4] sm:$0x3] }
 0x142   : > { %v553_v21 = vadd.f32 %v547_v16, %v495_v20  ;;  %v1164_v22 = vpop.f32.mrf.mxu1  ;;  %v753_v18 = vld [vmem:[#allocation2 + $0x6] sm:$0x3] }
 0x144   : > { %1306 = vtanh.f32 %v553_v21  ;;  %v1118_v25 = vmul.f32 -1.442695, %v553_v21 }
 0x146   : > { %1308 = vpow2.f32 %v1118_v25 }
 0x151   : > { %v1307_v23 = vpop.eup %1306 }
 0x152   : > { %567 = vrot.lane.b32.xlu0 %v1307_v23, %s1631_s11 }
 0x153   : > { %v1309_v26 = vpop.eup %1308 }
 0x154   : > { %v557_v27 = vadd.f32 1.0, %v1309_v26 }
 0x156   : > { %562 = vrot.lane.b32.xlu0 %v494_v24, %s1632_s26  ;;  %1310 = vrcp.f32 %v557_v27 }
 0x163   : > { %v1311_v28 = vpop.eup %1310 }
 0x1c4   : > { %v568_v29 = vpop.permute.xlu0 %567 }
 0x1c5   : > { %v570_v30 = vmul.f32 %v1311_v28, %v568_v29 }
 0x1c7   : > { %572 = vrot.lane.b32.xlu1 %v570_v30, %s1632_s26 }
 0x1c8   : > { %v563_v31 = vpop.permute.xlu0 %562 }
 0x1c9   : > { %v565_v32 = vmul.f32 %v1311_v28, %v563_v31 }
 0x239   : > { %v573_v33 = vpop.permute.xlu1 %572 }
 0x23a   : > { %v575_v34 = vadd.f32 %v573_v33, %v565_v32 }
 0x23c   : > { %1312 = vtanh.f32 %v575_v34 }
 0x249   : > { %v1313_v35 = vpop.eup %1312 }
 0x24a   : > { %578 = vrot.lane.b32.xlu1 %v1313_v35, %s1631_s11 }
 0x2bc   : > { %v579_v36 = vpop.permute.xlu1 %578 }
 0x2bd   : > { %v1879_v37 = vmul.f32 %v1311_v28, %v579_v36 }
 0x2bf   : > { %v592_v38 = vpack.c.bf16 %v1879_v37, %v1879_v37 }
 0x2c1   : > { %594 = vrot.lane.b32.xlu0 %v592_v38, %s1632_s26  ;;  %v589_v38 = vmul.f32 %v1879_v37, %v1879_v37 }
 0x333   : > { %v595_v39 = vpop.permute.xlu0 %594 }
 0x334   : > { %1170 = vmatmul.mubr.msk.bf16.vlgmr.msra.gmra.mxu0 %vm509_vm4, %v595_v39 }
 0x335   : > { %1182 = vmatpush3.bf16.msra.mxu0 %v1847_v5  ;;  %1185 = vmatprep.mubr.msk.bf16.mxu0 %vm1630_vm2, %v1629_v4 }
 0x336   : > { %1183 = vmatprep.subr.bf16.mxu0 %v1629_v4 }
 0x339   : > { %1184 = vmatpush3.bf16.msra.mxu0 %v1852_v8 }
 0x3f4   : > { %v633_v41 = vpop.f32.mrf.mxu0 }
 0x3f5   : > { %v639_v42 = vadd.f32 %v633_v41, %v591_v40 }
 0x3f6   : > { %v1171_v43 = vpop.f32.mrf.mxu0 }
 0x3f7   : > { %1314 = vtanh.f32 %v639_v42  ;;  %v1120_v47 = vmul.f32 -1.442695, %v639_v42 }
 0x3f8   : > { %v636_v44 = vpop.f32.mrf.mxu0 }
 0x3f9   : > { %1316 = vpow2.f32 %v1120_v47 }
 0x3fa   : > { %v1172_v45 = vpop.f32.mrf.mxu0 }
 0x404   : > { %v1315_v46 = vpop.eup %1314 }
 0x405   : > { %649 = vrot.lane.b32.xlu1 %v1315_v46, %s1631_s11 }
 0x406   : > { %v1317_v48 = vpop.eup %1316 }
 0x407   : > { %v643_v49 = vadd.f32 1.0, %v1317_v48 }
 0x409   : > { %1318 = vrcp.f32 %v643_v49 }
 0x416   : > { %v1319_v50 = vpop.eup %1318 }
 0x417   : > { %v647_v53 = vmul.f32 %v1319_v50, %v575_v34 }
 0x477   : > { %v650_v51 = vpop.permute.xlu1 %649 }
 0x478   : > { %v652_v52 = vmul.f32 %v1319_v50, %v650_v51  ;;  %v1633_v51 = vmov 1966171168  }
 0x47a   : > { %654 = vrot.lane.b32.xlu0 %v652_v52, %s1632_s26  ;;  %v851_v52 = vunpack.c.l.s4 %v1633_v51 }
 0x4ec   : > { %v655_v54 = vpop.permute.xlu0 %654 }
 0x4ed   : > { %v657_v55 = vadd.f32 %v655_v54, %v647_v53  ;;  %v853_v53 = vlaneseq }
 0x4ef   : > { %1320 = vtanh.f32 %v657_v55 }
 0x4fc   : > { %v1321_v56 = vpop.eup %1320 }
 0x4fd   : > { %660 = vrot.lane.b32.xlu1 %v1321_v56, %s1631_s11 }
 0x56f   : > { %v661_v57 = vpop.permute.xlu1 %660 }
 0x570   : > { %v1893_v58 = vmul.f32 %v1319_v50, %v661_v57 }
 0x572   : > { %v673_v59 = vpack.c.bf16 %v1893_v58, %v1893_v58  ;;  %v670_v36 = vmul.f32 %v1893_v58, %v1893_v58  ;;  %v669_v39 = vadd.f32 %v1893_v58, %v1879_v37 }
 0x574   : > { %675 = vrot.lane.b32.xlu0 %v673_v59, %s1632_s26  ;;  %v671_v42 = vadd.f32 %v670_v36, %v589_v38  ;;  %v852_v59 = vunpack.c.0.s8 %v851_v52 }
 0x5e6   : > { %v676_v60 = vpop.permute.xlu0 %675 }
 0x5e7   : > { %1178 = vmatmul.mubr.msk.bf16.vlgmr.msra.gmra.mxu1 %vm509_vm4, %v676_v60  ;;  %v854_v60 = vshrl.u32 %v853_v53, 7 }
 0x6a7   : > { %v714_v62 = vpop.f32.mrf.mxu1 }
 0x6a8   : > { %v720_v63 = vadd.f32 %v714_v62, %v672_v61 }
 0x6a9   : > { %v1179_v0 = vpop.f32.mrf.mxu1 }
 0x6aa   : > { %1322 = vtanh.f32 %v720_v63  ;;  %v1122_v4 = vmul.f32 -1.442695, %v720_v63  ;;  %v855_v0 = vsub.s32 %v852_v59, %v854_v60 }
 0x6ab   : > { %v717_v1 = vpop.f32.mrf.mxu1 }
 0x6ac   : > { %1324 = vpow2.f32 %v1122_v4 }
 0x6ad   : > { %v1180_v2 = vpop.f32.mrf.mxu1 }
 0x6b7   : > { %v1323_v3 = vpop.eup %1322 }
 0x6b8   : > { %730 = vrot.lane.b32.xlu1 %v1323_v3, %s1631_s11 }
 0x6b9   : > { %v1325_v5 = vpop.eup %1324 }
 0x6ba   : > { %v724_v6 = vadd.f32 1.0, %v1325_v5 }
 0x6bc   : > { %1326 = vrcp.f32 %v724_v6 }
 0x6c9   : > { %v1327_v7 = vpop.eup %1326 }
 0x6ca   : > { %v728_v10 = vmul.f32 %v1327_v7, %v657_v55 }
 0x72a   : > { %v731_v8 = vpop.permute.xlu1 %730 }
 0x72b   : > { %v733_v9 = vmul.f32 %v1327_v7, %v731_v8 }
 0x72d   : > { %735 = vrot.lane.b32.xlu0 %v733_v9, %s1632_s26 }
 0x79f   : > { %v736_v11 = vpop.permute.xlu0 %735 }
 0x7a0   : > { %v738_v12 = vadd.f32 %v736_v11, %v728_v10 }
 0x7a2   : > { %1328 = vtanh.f32 %v738_v12 }
 0x7af   : > { %v1329_v13 = vpop.eup %1328 }
 0x7b0   : > { %741 = vrot.lane.b32.xlu1 %v1329_v13, %s1631_s11 }
 0x822   : > { %v742_v14 = vpop.permute.xlu1 %741 }
 0x823   : > { %v1902_v15 = vmul.f32 %v1327_v7, %v742_v14 }
 0x825   : > { %v754_v16 = vpack.c.bf16 %v1902_v15, %v1902_v15  ;;  %v751_v40 = vmul.f32 %v1902_v15, %v1902_v15  ;;  %v750_v43 = vadd.f32 %v1902_v15, %v669_v39 }
 0x827   : > { %756 = vrot.lane.b32.xlu0 %v754_v16, %s1632_s26  ;;  %v752_v45 = vadd.f32 %v751_v40, %v671_v42 }
 0x899   : > { %v757_v17 = vpop.permute.xlu0 %756 }
 0x89a   : > { %1186 = vmatmul.mubr.msk.bf16.vlgmr.msra.gmra.mxu0 %vm509_vm4, %v757_v17 }
 0x95a   : > { %v795_v19 = vpop.f32.mrf.mxu0 }
 0x95b   : > { %v801_v20 = vadd.f32 %v795_v19, %v753_v18 }
 0x95c   : > { %v1187_v21 = vpop.f32.mrf.mxu0 }
 0x95d   : > { %1330 = vtanh.f32 %v801_v20  ;;  %v1124_v25 = vmul.f32 -1.442695, %v801_v20 }
 0x95e   : > { %v798_v22 = vpop.f32.mrf.mxu0 }
 0x95f   : > { %1332 = vpow2.f32 %v1124_v25 }
 0x960   : > { %v1188_v23 = vpop.f32.mrf.mxu0 }
 0x96a   : > { %v1331_v24 = vpop.eup %1330 }
 0x96b   : > { %811 = vrot.lane.b32.xlu1 %v1331_v24, %s1631_s11 }
 0x96c   : > { %v1333_v26 = vpop.eup %1332 }
 0x96d   : > { %v805_v27 = vadd.f32 1.0, %v1333_v26 }
 0x96f   : > { %1334 = vrcp.f32 %v805_v27 }
 0x97c   : > { %v1335_v28 = vpop.eup %1334 }
 0x97d   : > { %v809_v31 = vmul.f32 %v1335_v28, %v738_v12 }
 0x9dd   : > { %v812_v29 = vpop.permute.xlu1 %811 }
 0x9de   : > { %v814_v30 = vmul.f32 %v1335_v28, %v812_v29 }
 0x9e0   : > { %816 = vrot.lane.b32.xlu0 %v814_v30, %s1632_s26 }
 0x9e4   : > { %665 = vrot.lane.b32.xlu0 %v1893_v58, %s1632_s26 }
 0xa52   : > { %v817_v32 = vpop.permute.xlu0 %816 }
 0xa53   : > { %v819_v33 = vadd.f32 %v817_v32, %v809_v31 }
 0xa55   : > { %1336 = vtanh.f32 %v819_v33 }
 0xa56   : > { %v666_v34 = vpop.permute.xlu0 %665 }
 0xa57   : > { %668 = vst.msk [vmem:[%s1838_s1 + $0x2] sm:$0x3] %vm586_vm5, %v666_v34 }
 0xa62   : > { %v1337_v35 = vpop.eup %1336 }
 0xa63   : > { %822 = vrot.lane.b32.xlu1 %v1337_v35, %s1631_s11 }
 0xa67   : > { %583 = vrot.lane.b32.xlu1 %v1879_v37, %s1632_s26 }
 0xad5   : > { %v823_v41 = vpop.permute.xlu1 %822 }
 0xad6   : > { %v825_v44 = vmul.f32 %v1335_v28, %v823_v41 }
 0xad8   : > { %v831_v46 = vadd.f32 %v825_v44, %v750_v43  ;;  %v832_v47 = vmul.f32 %v825_v44, %v825_v44  ;;  %827 = vrot.lane.b32.xlu0 %v825_v44, %s1632_s26 }
 0xad9   : > { %v584_v48 = vpop.permute.xlu1 %583 }
 0xada   : > { %v833_v49 = vadd.f32 %v832_v47, %v752_v45  ;;  %v842_v50 = vsel %vm841_vm6, %v831_v46, 0.0  ;;  %587 = vst.msk [vmem:[%s1838_s1] sm:$0x3] %vm586_vm5, %v584_v48 }
 0xadb   : > { %v843_v37 = vrot.slane %v842_v50, 4 }
 0xadc   : > { %v871_v54 = vsel %vm841_vm6, %v833_v49, 0.0 }
 0xadd   : > { %v844_v55 = vadd.f32 %v843_v37, %v842_v50  ;;  %v872_v56 = vrot.slane %v871_v54, 4 }
 0xadf   : > { %v845_v57 = vrot.slane %v844_v55, 2  ;;  %v873_v58 = vadd.f32 %v872_v56, %v871_v54 }
 0xae1   : > { %v846_v61 = vadd.f32 %v845_v57, %v844_v55  ;;  %v874_v62 = vrot.slane %v873_v58, 2 }
 0xae3   : > { %v847_v63 = vrot.slane %v846_v61, 1  ;;  %v875_v1 = vadd.f32 %v874_v62, %v873_v58 }
 0xae5   : > { %v848_v2 = vadd.f32 %v847_v63, %v846_v61  ;;  %v876_v3 = vrot.slane %v875_v1, 1 }
 0xae7   : > { %v856_v4 = vrot.slane %v848_v2, %v855_v0  ;;  %v877_v5 = vadd.f32 %v876_v3, %v875_v1 }
 0xae9   : > { %v863_v6 = vrot.slane %v856_v4, %v855_v0  ;;  %v885_v7 = vrot.slane %v877_v5, %v855_v0 }
 0xaeb   : > { %864 = vrot.lane.b32.xlu0 %v863_v6, %s1632_s26  ;;  %v892_v8 = vrot.slane %v885_v7, %v855_v0 }
 0xaed   : > { %893 = vrot.lane.b32.xlu1 %v892_v8, %s1632_s26 }
 0xaef   : > { %836 = vrot.lane.b32.xlu0 %v819_v33, %s1634_s18 }
 0xaf1   : > { %746 = vrot.lane.b32.xlu1 %v1902_v15, %s1632_s26 }
 0xb4a   : > { %v828_v9 = vpop.permute.xlu0 %827 }
 0xb4b   : > { %830 = vst.msk [vmem:[%s1838_s1 + $0x6] sm:$0x3] %vm586_vm5, %v828_v9  ;;  %834 = vst.msk [vmem:[#allocation12] sm:$0x3] %vm586_vm5, %v828_v9 }
 0xb4c   : > { %1457 = shalt.err (!%p1454_p5)
}
 0xb4d   : > { %p2072_p2 = pmov %p2071_p7  ;;  %v840_v10 = vld [vmem:[#allocation15] sm:$0x1]  ;;  %s1636_s23 = smov [#allocation15]   ;;  %v870_v12 = vld [vmem:[#allocation17] sm:$0x1]  ;;  %vm868_vm7 = vcmask 253952  }
 0xb4e   : > { %s945_s12 = sshll.u32 %s1636_s23, 4  ;;  %s1637_s15 = smov [#allocation14]   ;;  %s946_s12 = int_to_ptr.vmem [resolvable:$true] %s945_s12 }
 0xb4f   : > { %1205 = dma.vmem_to_hbm [thread:$0]  (%p2072_p2), %s924_s28, 32, %s2040_s7, [#allocation13]  }
 0xb50   : > { %s934_s19 = sshll.u32 %s1637_s15, 4  ;;  %s1638_s21 = smov [#allocation17]   ;;  %s935_s19 = int_to_ptr.vmem [resolvable:$true] %s934_s19 }
 0xb51   : > { %s956_s29 = sshll.u32 %s1638_s21, 4  ;;  %s1126_s11 = sshll.u32 %s1716_s17, 7  ;;  %s1946_s29 = int_to_ptr.vmem [resolvable:$true] %s956_s29 }
 0xb52   : > { %s912_s26 = sshll.u32 %s1838_s1, 4  ;;  %s1468_s18 = scalar_lea.vmem %s946_s12, 16  ;;  %s1962_s26 = int_to_ptr.vmem [resolvable:$true] %s912_s26 }
 0xb53   : > { %p1469_p8 = scmp.ne.s32.totalorder %s946_s12, %s1468_s18  ;;  %p2073_p12 = pmov %p2072_p2 }
 0xb54   : > { %s1474_s22 = scalar_lea.vmem %s946_s12, 32  ;;  %p1475_p9 = scmp.lt.s32.totalorder %s946_s12, %s946_s12 }
 0xb55   : > { %p1470_p4 = pnand %p1469_p8, %p2073_p12  ;;  %p1476_p13 = scmp.lt.s32.totalorder %s1474_s22, %s1468_s18 }
 0xb57   : > { %p1471_p6 = pneg %p1470_p4  ;;  %p1477_p7 = por %p1476_p13, %p1475_p9 }
 0xb59   : > { %p1478_p11 = pnand %p1477_p7, %p1471_p6 }
 0xb5d   : > { %v865_v11 = vpop.permute.xlu0 %864 }
 0xb5e   : > { %v867_v13 = vadd.f32 %v865_v11, %v840_v10 }
 0xb5f   : > { %v894_v14 = vpop.permute.xlu1 %893 }
 0xb60   : > { %v896_v15 = vadd.f32 %v894_v14, %v870_v12  ;;  %869 = vst.msk [vmem:[#allocation15] sm:$0x1] %vm868_vm7, %v867_v13 }
 0xb61   : > { %v837_v16 = vpop.permute.xlu0 %836 }
 0xb62   : > { %1481 = shalt.err (!%p1478_p11)
}
 0xb63   : > { %p2074_p0 = pmov %p2072_p2  ;;  %839 = vst.msk [vmem:[#allocation14] sm:$0x3] %vm586_vm5, %v837_v16  ;;  %s1960_s23 = scalar_lea.hbm %s2039_s6, %s1126_s11  ;;  %v747_v17 = vpop.permute.xlu1 %746 }
 0xb64   : > { %897 = vst.msk [vmem:[#allocation17] sm:$0x1] %vm868_vm7, %v896_v15  ;;  %s1492_s15 = scalar_lea.vmem %s935_s19, 32  ;;  %p1499_p2 = scmp.lt.s32.totalorder %s935_s19, %s935_s19 }
 0xb65   : > { %1209 = dma.vmem_to_hbm [thread:$0]  (%p2074_p0), %s946_s12, 16, %s2042_s9, [#allocation16]  }
 0xb66   : > { %p1493_p3 = scmp.ne.s32.totalorder %s935_s19, %s1492_s15  ;;  %p2075_p1 = pmov %p2074_p0 }
 0xb67   : > { %p1500_p8 = scmp.lt.s32.totalorder %s1492_s15, %s1492_s15 }
 0xb68   : > { %p1494_p10 = pnand %p1493_p3, %p2075_p1 }
 0xb69   : > { %p1501_p12 = por %p1500_p8, %p1499_p2 }
 0xb6a   : > { %p1495_p5 = pneg %p1494_p10 }
 0xb6c   : > { %p1502_p4 = pnand %p1501_p12, %p1495_p5 }
 0xb6e   : > { %1505 = shalt.err (!%p1502_p4)
}
 0xb6f   : > { %p2076_p6 = pmov %p2074_p0  ;;  %749 = vst.msk [vmem:[%s1838_s1 + $0x4] sm:$0x3] %vm586_vm5, %v747_v17  ;;  %s1516_s11 = scalar_lea.vmem %s1946_s29, 16 }
 0xb70   : > { %p1517_p9 = scmp.ne.s32.totalorder %s1946_s29, %s1516_s11  ;;  %p2077_p13 = pmov %p2074_p0 }
 0xb71   : > { %1207 = dma.vmem_to_hbm [thread:$0]  (%p2076_p6), %s935_s19, 32, %s2041_s8, [#allocation13]  }
 0xb72   : > { %p1518_p7 = pnand %p1517_p9, %p2077_p13  ;;  %s1522_s18 = scalar_lea.vmem %s1946_s29, 32 }
 0xb73   : > { %p1523_p0 = scmp.lt.s32.totalorder %s1946_s29, %s1946_s29  ;;  %p1524_p3 = scmp.lt.s32.totalorder %s1522_s18, %s1516_s11 }
 0xb74   : > { %p1519_p11 = pneg %p1518_p7 }
 0xb75   : > { %p1525_p1 = por %p1524_p3, %p1523_p0 }
 0xb77   : > { %p1526_p10 = pnand %p1525_p1, %p1519_p11 }
 0xb79   : > { %1529 = shalt.err (!%p1526_p10)
}
 0xb7a   : > { %p2078_p5 = pmov %p2076_p6  ;;  %s899_s1 = scalar_lea.sflag [#allocation5], %s1822_s3 }
 0xb7b   : > { %s1540_s19 = scalar_lea.vmem %s1962_s26, 128  ;;  %p2079_p8 = scmp.ne.s32.totalorder %s2062_s24, 0 }
 0xb7c   : > { %1211 = dma.vmem_to_hbm [thread:$0]  (%p2078_p5), %s1946_s29, 16, %s2043_s10, [#allocation16]  }
 0xb7d   : > { %p1541_p2 = scmp.ne.s32.totalorder %s1962_s26, %s1540_s19  ;;  %s1639_s30 = smov [#allocation11]  }
 0xb7e   : > { %s1544_s27 = sshll.u32 %s1639_s30, 4  ;;  %s1545_s27 = int_to_ptr.vmem [resolvable:$false] %s1544_s27 }
 0xb7f   : > { %p1542_p12 = pnand %p1541_p2, %p2079_p8  ;;  %s1546_s5 = scalar_lea.vmem %s1545_s27, 256 }
 0xb80   : > { %p1547_p6 = scmp.lt.s32.totalorder %s1962_s26, %s1545_s27  ;;  %p1548_p9 = scmp.lt.s32.totalorder %s1546_s5, %s1540_s19 }
 0xb81   : > { %p1543_p4 = pneg %p1542_p12 }
 0xb82   : > { %p1549_p13 = por %p1548_p9, %p1547_p6 }
 0xb84   : > { %p1550_p7 = pnand %p1549_p13, %p1543_p4 }
 0xb86   : > { %1553 = shalt.err (!%p1550_p7)
}
 0xb87   : > { %s1554_s29 = scalar_lea.hbm %s1960_s23, 128  ;;  %s1558_s12 = scalar_lea.hbm %s2039_s6, 256 }
 0xb88   : > { %p1555_p11 = scmp.ne.s32.totalorder %s1960_s23, %s1554_s29  ;;  %p1559_p1 = scmp.lt.s32.totalorder %s1960_s23, %s2039_s6 }
 0xb89   : > { %p1560_p10 = scmp.lt.s32.totalorder %s1558_s12, %s1554_s29 }
 0xb8a   : > { %p1556_p0 = pnand %p1555_p11, %p2079_p8 }
 0xb8b   : > { %p1561_p5 = por %p1560_p10, %p1559_p1 }
 0xb8c   : > { %p1557_p3 = pneg %p1556_p0 }
 0xb8e   : > { %p1562_p2 = pnand %p1561_p5, %p1557_p3 }
 0xb90   : > { %1565 = shalt.err (!%p1562_p2)
}
 0xb91   : > { %1203 = dma.vmem_to_hbm [thread:$0]  (%p2079_p8), %s1962_s26, 128, %s1960_s23, %s899_s1  }
 0xb92   : > { %p2080_p12 = scmp.eq.s32.totalorder %s1716_s17, 1 }
 0xb94   : > { %1595 = dma.done.wait (%p2080_p12), [#allocation13], 64   ;;  %p2081_p4 = pmov %p2080_p12 }
 0xb96   : > { %1597 = vsyncadd (%p2081_p4), [#allocation13], 4294967232  ;;  %p2082_p6 = pmov %p2081_p4 }
 0xb97   : > { %p2083_p9 = pmov %p2081_p4 }
 0xb98   : > { %1599 = dma.done.wait (%p2082_p6), [#allocation16], 32  }
 0xb99   : > { %1601 = vsyncadd (%p2083_p9), [#allocation16], 4294967264 }
 0xb9a PF: > { %s984_s24 = sand.u32 1, %s1608_s13   ;;  %p2084_p13 = scmp.ne.s32.totalorder %s2054_s20, 0 }
 0xb9b   : > { %p2085_p7 = scmp.ge.s32.totalorder %s1620_s16, 2  ;;  %s985_s26 = scalar_lea.sflag [#allocation5], %s984_s24 }
 0xb9d   : > { %p1236_p11 = pnand %p2085_p7, %p2084_p13 }
 0xb9f   : > { %p1237_p8 = pneg %p1236_p11 }
 0xba1   : > { %1603 = dma.done.wait (%p1237_p8), %s985_s26, 128  }
 0xba2   : > { %1605 = vsyncadd (%p1237_p8), %s985_s26, 4294967168  ;;  %s2086_s23 = sld [smem:[#allocation24_spill]]  ;;  %p28_p0 = scmp.ge.s32.totalorder %s1776_s25, 4  }
 0xba3   : > { %s2087_s15 = sld [smem:[#allocation25_spill]]  ;;  %s2088_s13 = smov %s1612_s14 }
 0xba4   : > { %s2090_s16 = smov %s1776_s25  ;;  %30 = sbr.rel (!%p28_p0) target bundleno = 13 (0xd), region = 140 }
 0xba8   : > { %s2089_s14 = smov %s2086_s23 }
 0xba9   :  { %990 = vsyncpa [#allocation4], 1 }
 0xbaa   :  { %992 = vsyncpa [#allocation4 + $0x1], 1 }
 0xbab   :  { %993 = vsyncpa [#allocation7], 1 }
 0xbac   :  { %994 = vsyncpa [#allocation10], 1 }
 0xbad   :  { %995 = vsyncpa [#allocation5], 1 }
 0xbae   :  { %997 = vsyncpa [#allocation5 + $0x1], 1 }
 0xbaf   :  { %998 = vsyncpa [#allocation13], 1 }
 0xbb0   :  { %999 = vsyncpa [#allocation16], 1 }

</bundles_post_ra>
